<compile_context>
chip_gen: v7x
topology: tpu7x:2x2x1
jax: 0.10.0
libtpu: 0.0.40
codegen_flags: <defaults>
</compile_context>

<pallas_src>
import functools

import numpy as np
import jax
import jax.numpy as jnp
from jax import lax
from jax.experimental import pallas as pl
from jax.experimental.pallas import tpu as pltpu

_LANES = 128     # lane-dense accumulator width (one lane per top-k slot)
_ACC_ROWS = 8    # sublane-aligned accumulator rows per split


def _accuracy_kernel(pred_ref, tgt_ref, kvec_ref, out_ref, *, thresh, n_rows,
                     blocks_per_split, tm, chunk, n_chunks, unroll):
    p = pl.program_id(0)          # split (parallel) index
    i = pl.program_id(1)          # row-block index within this split

    @pl.when(i == 0)
    def _():
        out_ref[...] = jnp.zeros_like(out_ref)

    block_idx = p * blocks_per_split + i          # UNclamped global block id
    row_base = block_idx * tm
    k_vec = kvec_ref[...]                         # (1, 128) int32, hoisted out of the loop
    c = pred_ref.shape[1]

    def chunk_body(j, acc):
        start = j * chunk
        if not isinstance(start, int):
            start = pl.multiple_of(start, chunk)
        # Native-dtype chunk of logits: stays within ~16 vregs, no VMEM spill.
        work = pred_ref[pl.ds(start, chunk), :]                      # (chunk, C)
        tgt = tgt_ref[pl.ds(start, chunk), :].astype(jnp.int32)      # (chunk, 1)
        col_ids = lax.broadcasted_iota(jnp.int32, (chunk, c), 1)
        neg_inf = jnp.asarray(-jnp.inf, dtype=work.dtype)

        # Target-class score per row (-inf if target id is out of range).
        tgt_score = jnp.max(jnp.where(col_ids == tgt, work, neg_inf),
                            axis=-1, keepdims=True)                  # (chunk, 1)

        # 0-based rank under "higher score first, ties -> lower class index"
        # (matches stable argsort(-pred) / first-occurrence top-k semantics).
        ahead = (work > tgt_score) | ((work == tgt_score) & (col_ids < tgt))
        rank = jnp.sum(ahead.astype(jnp.int32), axis=-1, keepdims=True)  # (chunk, 1)

        # Row validity (ragged tail + duplicated clamped blocks) + thresh gate.
        row_ids = row_base + start + lax.broadcasted_iota(jnp.int32, (chunk, 1), 0)
        ok = row_ids < n_rows
        if thresh is not None:
            ok = ok & (tgt_score.astype(jnp.float32) > jnp.float32(thresh))

        hit = (rank < k_vec) & ok                                    # (chunk, 128)
        # Reduce chunk -> 8 sublane rows with pure vreg adds (no XLU reduce).
        partial = jnp.sum(hit.astype(jnp.float32).reshape(chunk // _ACC_ROWS,
                                                          _ACC_ROWS, _LANES),
                          axis=0)                                    # (8, 128)
        return acc + partial

    acc0 = jnp.zeros((_ACC_ROWS, _LANES), jnp.float32)
    if n_chunks == 1:
        acc = chunk_body(0, acc0)
    else:
        acc = lax.fori_loop(0, n_chunks, chunk_body, acc0, unroll=unroll)

    out_ref[...] += acc


def _vmem_capacity_bytes():
    try:
        info = pltpu.get_tpu_info()
        cap = getattr(info, "vmem_capacity_bytes", None)
        if cap:
            return int(cap)
    except Exception:
        pass
    return 64 * 1024 * 1024   # conservative (v7x per-TC physical)


def _num_splits():
    # 2 TensorCores per chip on v7x (and megacore-capable v4/v5p); 1 on v5e/v6e.
    try:
        kind = jax.devices()[0].device_kind.lower()
    except Exception:
        return 1
    if any(tag in kind for tag in ("v7", "7x", "v4", "v5p")):
        return 2
    return 1


def accuracy_pallas(pred, target, topk=(1,), thresh=None):
    """JAX/Pallas equivalent of cspnext accuracy(pred, target, topk, thresh)."""
    assert isinstance(topk, (int, tuple))
    if isinstance(topk, int):
        topk = (topk,)
        return_single = True
    else:
        return_single = False
    assert len(topk) <= _LANES, "len(topk) must be <= 128 (lane-scatter width)"

    assert pred.ndim == 2 and target.ndim == 1
    n, c = pred.shape
    assert target.shape[0] == n
    maxk = max(topk)
    assert maxk <= c, f"maxk {maxk} exceeds pred dimension {c}"

    if n == 0:
        accu = [jnp.zeros((1,), jnp.float32) for _ in topk]
        return accu[0] if return_single else accu

    if pred.dtype not in (np.dtype(jnp.float32), np.dtype(jnp.bfloat16),
                          np.dtype(jnp.float16)):
        pred = pred.astype(jnp.float32)
    itemsize = np.dtype(pred.dtype).itemsize

    c_pad = ((c + _LANES - 1) // _LANES) * _LANES      # VMEM lane padding
    n_pad8 = ((n + 7) // 8) * 8

    # Per-chunk logits working set ~<= 64 KiB (~16 vregs) -> vreg-resident math.
    # TODO(synk): for small C (<128) repack classes onto sublanes to use all lanes.
    chunk = (64 * 1024) // max(1, c_pad * itemsize)
    chunk = max(8, min(256, (chunk // 8) * 8))
    chunk = max(8, min(chunk, n_pad8))

    # Dtype/padding-aware row tile, double-buffered, gated on VMEM capacity.
    # TODO(synk): add a class-chunk grid axis for vocab-scale C (the rank
    # formulation accumulates per-chunk counts cleanly).
    vmem_cap = _vmem_capacity_bytes()
    budget = max(32 << 20, min((vmem_cap * 3) // 4, 100 << 20))
    per_row = c_pad * itemsize + _LANES * 4     # pred row + lane-padded int32 target row
    tm = (budget - (4 << 20)) // (2 * per_row)  # 2 pipeline buffers per input
    tm = max(chunk, (min(tm, 2048) // chunk) * chunk)
    tm = min(tm, ((n + chunk - 1) // chunk) * chunk)
    n_chunks = tm // chunk

    splits = _num_splits()
    n_blocks = pl.cdiv(n, tm)
    blocks_per_split = pl.cdiv(n_blocks, splits)

    tgt2 = target.astype(jnp.int32).reshape(n, 1)      # tiny; no pred copy needed

    # Lane-dense k thresholds, built once on the host (lane s holds topk[s],
    # remaining lanes 0 so (rank < 0) is never true there).
    kvec_np = np.zeros((1, _LANES), np.int32)
    kvec_np[0, :len(topk)] = np.asarray(topk, np.int32)
    kvec = jnp.asarray(kvec_np)

    def row_block(p, i):
        # Clamp so the DMA window always stays in bounds; the in-kernel row
        # mask zero-contributes any duplicate / out-of-range block.
        return (jnp.minimum(p * blocks_per_split + i, n_blocks - 1), 0)

    kernel = functools.partial(
        _accuracy_kernel, thresh=thresh, n_rows=n,
        blocks_per_split=blocks_per_split, tm=tm, chunk=chunk,
        n_chunks=n_chunks, unroll=(n_chunks <= 8))

    counts = pl.pallas_call(
        kernel,
        out_shape=jax.ShapeDtypeStruct((splits * _ACC_ROWS, _LANES), jnp.float32),
        grid_spec=pltpu.PrefetchScalarGridSpec(
            num_scalar_prefetch=0,
            grid=(splits, blocks_per_split),
            in_specs=[
                pl.BlockSpec((tm, c), row_block),
                pl.BlockSpec((tm, 1), row_block),
                pl.BlockSpec((1, _LANES), lambda p, i: (0, 0)),
            ],
            out_specs=pl.BlockSpec((_ACC_ROWS, _LANES), lambda p, i: (p, 0)),
        ),
        compiler_params=pltpu.CompilerParams(
            dimension_semantics=("parallel", "arbitrary"),
            vmem_limit_bytes=int(budget),
        ),
    )(pred, tgt2, kvec)

    totals = jnp.sum(counts, axis=0)                   # (128,)
    scale = 100.0 / n
    res = [totals[slot:slot + 1] * scale for slot in range(len(topk))]
    return res[0] if return_single else res


class Accuracy:
    """Pallas port of cspnext.losses.accuracy.Accuracy (no learnable params)."""

    def __init__(self, topk=(1,), thresh=None):
        self.topk = topk
        self.thresh = thresh

    def __call__(self, pred, target):
        return accuracy_pallas(pred, target, self.topk, self.thresh)


def _reference_accuracy(pred, target, topk=(1,), thresh=None):
    """Pure-JAX reference for verification."""
    if isinstance(topk, int):
        topk = (topk,)
    maxk = max(topk)
    n = pred.shape[0]
    order = jnp.argsort(-pred, axis=1)[:, :maxk]             # (N, maxk)
    values = jnp.take_along_axis(pred, order, axis=1)        # (N, maxk)
    correct = order == target[:, None]
    if thresh is not None:
        correct = correct & (values > thresh)
    return [jnp.sum(correct[:, :k].astype(jnp.float32)).reshape(1) * (100.0 / n)
            for k in topk]


if __name__ == "__main__":
    key = jax.random.PRNGKey(0)
    k1, k2, k3, k4, k5, k6 = jax.random.split(key, 6)

    # Small case: tiny single-chunk tile, tuple topk, split dedup masking.
    N, C = 16, 10
    pred = jax.random.normal(k1, (N, C), dtype=jnp.float32)
    target = jax.random.randint(k2, (N,), 0, C, dtype=jnp.int32)
    module = Accuracy(topk=(1, 3), thresh=None)
    out = [jax.block_until_ready(o) for o in module(pred, target)]
    ref = _reference_accuracy(pred, target, (1, 3), None)
    for o, r in zip(out, ref):
        assert jnp.allclose(o, r, atol=1e-3), (o, r)

    # Medium case: bf16 logits (native-dtype compares), ragged last tile,
    # multi-block accumulation, unrolled chunk loop, threshold path.
    N2, C2 = 2500, 64
    pred2 = jax.random.normal(k3, (N2, C2), dtype=jnp.float32).astype(jnp.bfloat16)
    target2 = jax.random.randint(k4, (N2,), 0, C2, dtype=jnp.int32)
    out2 = [jax.block_until_ready(o)
            for o in Accuracy(topk=(1, 5), thresh=0.5)(pred2, target2)]
    ref2 = _reference_accuracy(pred2.astype(jnp.float32), target2, (1, 5), 0.5)
    for o, r in zip(out2, ref2):
        assert jnp.allclose(o, r, atol=1e-3), (o, r)

    # Long-tile case: exercises the rolled (unroll=False) chunk loop path.
    N3, C3 = 3000, 8
    pred3 = jax.random.normal(k5, (N3, C3), dtype=jnp.float32)
    target3 = jax.random.randint(k6, (N3,), 0, C3, dtype=jnp.int32)
    out3 = [jax.block_until_ready(o)
            for o in Accuracy(topk=(1, 2), thresh=None)(pred3, target3)]
    ref3 = _reference_accuracy(pred3, target3, (1, 2), None)
    for o, r in zip(out3, ref3):
        assert jnp.allclose(o, r, atol=1e-3), (o, r)

    # int topk path
    single = Accuracy(topk=1, thresh=None)(pred, target)
    jax.block_until_ready(single)
    ref_single = _reference_accuracy(pred, target, (1,), None)[0]
    assert jnp.allclose(single, ref_single, atol=1e-3), (single, ref_single)

    print("KERNEL_OK")
</pallas_src>

<mosaic_0001>
module attributes {stable_mosaic.version = 11 : i64} {
  func.func @_accuracy_kernel(%arg0: i32, %arg1: i32, %arg2: memref<16x10xf32, #tpu.memory_space<vmem>>, %arg3: memref<16x1xi32, #tpu.memory_space<vmem>>, %arg4: memref<1x128xi32, #tpu.memory_space<vmem>>, %arg5: memref<8x128xf32, #tpu.memory_space<vmem>>) attributes {dimension_semantics = [#tpu.dimension_semantics<parallel>, #tpu.dimension_semantics<arbitrary>], iteration_bounds = array<i64: 1, 1>, scalar_prefetch = 0 : i64, scratch_operands = 0 : i64, tpu.core_type = #tpu.core_type<tc>, window_params = [{transform_indices = @transform_0, window_bounds = array<i64: 16, 10>}, {transform_indices = @transform_1, window_bounds = array<i64: 16, 1>}, {pipeline_mode = #tpu.pipeline_mode<synchronous>, transform_indices = @transform_2, window_bounds = array<i64: 1, 128>}, {transform_indices = @transform_3, window_bounds = array<i64: 8, 128>}]} {
    %c0_i32 = arith.constant 0 : i32
    %0 = arith.cmpi eq, %arg1, %c0_i32 : i32
    %1 = arith.extui %0 : i1 to i32
    %c0_i32_0 = arith.constant 0 : i32
    %2 = arith.cmpi ne, %1, %c0_i32_0 : i32
    scf.if %2 {
      %cst_16 = arith.constant 0.000000e+00 : f32
      %47 = vector.broadcast %cst_16 : f32 to vector<8x128xf32>
      %c0_17 = arith.constant 0 : index
      %c0_18 = arith.constant 0 : index
      %48 = vector.load %arg5[%c0_17, %c0_18] : memref<8x128xf32, #tpu.memory_space<vmem>>, vector<8x128xf32>
      tpu.vector_store %arg5[%c0_17, %c0_18], %47 {strides = array<i32>} : memref<8x128xf32, #tpu.memory_space<vmem>>, vector<8x128xf32>,
    } else {
    }
    %c1_i32 = arith.constant 1 : i32
    %3 = arith.muli %arg0, %c1_i32 : i32
    %4 = arith.addi %3, %arg1 : i32
    %c16_i32 = arith.constant 16 : i32
    %5 = arith.muli %4, %c16_i32 : i32
    %c0 = arith.constant 0 : index
    %c0_1 = arith.constant 0 : index
    %6 = vector.load %arg4[%c0, %c0_1] : memref<1x128xi32, #tpu.memory_space<vmem>>, vector<1x128xi32>
    %cst = arith.constant 0.000000e+00 : f32
    %7 = vector.broadcast %cst : f32 to vector<8x128xf32>
    %c0_2 = arith.constant 0 : index
    %c0_3 = arith.constant 0 : index
    %8 = vector.load %arg2[%c0_2, %c0_3] : memref<16x10xf32, #tpu.memory_space<vmem>>, vector<16x10xf32>
    %c0_4 = arith.constant 0 : index
    %c0_5 = arith.constant 0 : index
    %9 = vector.load %arg3[%c0_4, %c0_5] : memref<16x1xi32, #tpu.memory_space<vmem>>, vector<16x1xi32>
    %10 = tpu.iota {dimensions = array<i32: 1>} : vector<16x10xi32>
    %11 = vector.broadcast %9 : vector<16x1xi32> to vector<16x10xi32>
    %12 = arith.cmpi eq, %10, %11 : vector<16x10xi32>
    %cst_6 = arith.constant 0xFF800000 : f32
    %13 = vector.broadcast %cst_6 : f32 to vector<16x10xf32>
    %14 = arith.select %12, %8, %13 : vector<16x10xi1>, vector<16x10xf32>
    %cst_7 = arith.constant dense<0xFF800000> : vector<16xf32>
    %15 = vector.multi_reduction <maximumf>, %14, %cst_7 [1] : vector<16x10xf32> to vector<16xf32>
    %16 = vector.shape_cast %15 : vector<16xf32> to vector<16x1xf32>
    %17 = vector.broadcast %16 : vector<16x1xf32> to vector<16x10xf32>
    %18 = arith.cmpf ogt, %8, %17 : vector<16x10xf32>
    %19 = vector.broadcast %16 : vector<16x1xf32> to vector<16x10xf32>
    %20 = arith.cmpf oeq, %8, %19 : vector<16x10xf32>
    %21 = vector.broadcast %9 : vector<16x1xi32> to vector<16x10xi32>
    %22 = arith.cmpi slt, %10, %21 : vector<16x10xi32>
    %23 = arith.andi %20, %22 : vector<16x10xi1>
    %24 = arith.ori %18, %23 : vector<16x10xi1>
    %25 = arith.extui %24 : vector<16x10xi1> to vector<16x10xi32>
    %cst_8 = arith.constant dense<0> : vector<16xi32>
    %26 = vector.multi_reduction <add>, %25, %cst_8 [1] : vector<16x10xi32> to vector<16xi32>
    %27 = vector.shape_cast %26 : vector<16xi32> to vector<16x1xi32>
    %c0_i32_9 = arith.constant 0 : i32
    %28 = arith.addi %5, %c0_i32_9 : i32
    %29 = tpu.iota {dimensions = array<i32: 0>} : vector<16x1xi32>
    %30 = vector.broadcast %28 : i32 to vector<16x1xi32>
    %31 = arith.addi %30, %29 : vector<16x1xi32>
    %c16_i32_10 = arith.constant 16 : i32
    %32 = vector.broadcast %c16_i32_10 : i32 to vector<16x1xi32>
    %33 = arith.cmpi slt, %31, %32 : vector<16x1xi32>
    %34 = vector.broadcast %27 : vector<16x1xi32> to vector<16x128xi32>
    %35 = vector.broadcast %6 : vector<1x128xi32> to vector<16x128xi32>
    %36 = arith.cmpi slt, %34, %35 : vector<16x128xi32>
    %37 = vector.broadcast %33 : vector<16x1xi1> to vector<16x128xi1>
    %38 = arith.andi %36, %37 : vector<16x128xi1>
    %39 = arith.extui %38 : vector<16x128xi1> to vector<16x128xi32>
    %40 = arith.sitofp %39 : vector<16x128xi32> to vector<16x128xf32>
    %41 = vector.shape_cast %40 : vector<16x128xf32> to vector<2x8x128xf32>
    %cst_11 = arith.constant dense<0.000000e+00> : vector<8x128xf32>
    %42 = vector.multi_reduction <add>, %41, %cst_11 [0] : vector<2x8x128xf32> to vector<8x128xf32>
    %43 = arith.addf %7, %42 : vector<8x128xf32>
    %c0_12 = arith.constant 0 : index
    %c0_13 = arith.constant 0 : index
    %44 = vector.load %arg5[%c0_12, %c0_13] : memref<8x128xf32, #tpu.memory_space<vmem>>, vector<8x128xf32>
    %45 = arith.addf %44, %43 : vector<8x128xf32>
    %c0_14 = arith.constant 0 : index
    %c0_15 = arith.constant 0 : index
    %46 = vector.load %arg5[%c0_14, %c0_15] : memref<8x128xf32, #tpu.memory_space<vmem>>, vector<8x128xf32>
    tpu.vector_store %arg5[%c0_14, %c0_15], %45 {strides = array<i32>} : memref<8x128xf32, #tpu.memory_space<vmem>>, vector<8x128xf32>,
    return
  }
  func.func @transform_0(%arg0: i32, %arg1: i32) -> (i32, i32) {
    %c1_i32 = arith.constant 1 : i32
    %0 = arith.muli %arg0, %c1_i32 : i32
    %1 = arith.addi %0, %arg1 : i32
    %c0_i32 = arith.constant 0 : i32
    %2 = arith.minsi %1, %c0_i32 : i32
    %c0_i32_0 = arith.constant 0 : i32
    %c0_i32_1 = arith.constant 0 : i32
    return %2, %c0_i32_0 : i32, i32
  }
  func.func @transform_1(%arg0: i32, %arg1: i32) -> (i32, i32) {
    %c1_i32 = arith.constant 1 : i32
    %0 = arith.muli %arg0, %c1_i32 : i32
    %1 = arith.addi %0, %arg1 : i32
    %c0_i32 = arith.constant 0 : i32
    %2 = arith.minsi %1, %c0_i32 : i32
    %c0_i32_0 = arith.constant 0 : i32
    %c0_i32_1 = arith.constant 0 : i32
    return %2, %c0_i32_0 : i32, i32
  }
  func.func @transform_2(%arg0: i32, %arg1: i32) -> (i32, i32) {
    %c0_i32 = arith.constant 0 : i32
    %c0_i32_0 = arith.constant 0 : i32
    %c0_i32_1 = arith.constant 0 : i32
    return %c0_i32, %c0_i32_0 : i32, i32
  }
  func.func @transform_3(%arg0: i32, %arg1: i32) -> (i32, i32) {
    %c0_i32 = arith.constant 0 : i32
    %c0_i32_0 = arith.constant 0 : i32
    return %arg0, %c0_i32 : i32, i32
  }
}

</mosaic_0001>

<bundles_post_ra>
// kernel: tpu_custom_call.1
= control target key start
LH: loop header
LB: loop body
LE: loop exit
PB: predicated region body
PF: predicated region fallthrough
CT: control target
= control target key end

     0   :  { %s288_s0 = inlined_call_operand.vmem [shape: f32[16,10], index: 0, kind: input, shape index: {}]   ;;  %s289_s1 = inlined_call_operand.vmem [shape: s32[16,1], index: 1, kind: input, shape index: {}]   ;;  %s290_s2 = inlined_call_operand.vmem [shape: s32[1,128], index: 2, kind: input, shape index: {}]   ;;  %s291_s3 = inlined_call_operand.hbm [shape: f32[8,128], index: 3, kind: output, shape index: {}]  }
   0x1   :  { %v89_v0 = vld [vmem:[%s289_s1] sm:$0xff] }
   0x2   :  { %8 = vsyncpa [#allocation3], 0  ;;  %v234_v1 = vmov 0   ;;  %v90_v2 = vld [vmem:[%s289_s1 + $0x8] sm:$0xff]  ;;  %v91_v3 = vlaneseq  ;;  %v87_v5 = vld [vmem:[%s288_s0] sm:$0xff]  ;;  %vm103_vm0 = vcmask 80896  }
   0x3   :  { %209 = vset.pattern.permute.xlu0 %v234_v1  ;;  %v88_v9 = vld [vmem:[%s288_s0 + $0x8] sm:$0xff]  ;;  %v203_v35 = vld [vmem:[%s290_s2] ss:$0 sm:$0xff]  ;;  %v235_v40 = vmov 0.0   ;;  %s236_s20 = smov [#allocation2]  }
   0x4   :  { %94 = vperm.xlu0 %209, %v89_v0   ;;  %v92_v4 = vand.u32 127, %v91_v3  ;;  %s183_s21 = sshll.u32 %s236_s20, 4  ;;  %s184_s21 = int_to_ptr.vmem [resolvable:$true] %s183_s21 }
   0x5   :  { %s210_s22 = scalar_lea.vmem %s184_s21, 128  ;;  %p215_p1 = scmp.lt.s32.totalorder %s184_s21, %s184_s21 }
   0x6   :  { %p211_p0 = scmp.ne.s32.totalorder %s184_s21, %s210_s22  ;;  %p216_p2 = scmp.lt.s32.totalorder %s210_s22, %s210_s22 }
   0x8   :  { %97 = vperm.xlu0 %209, %v90_v2   ;;  %p217_p3 = por %p216_p2, %p215_p1 }
   0xa   :  { %p218_p4 = pnand %p217_p3, %p211_p0 }
  0x83   :  { %v95_v6 = vpop.permute.xlu0 %94 }
  0x84   :  { %vm114_vm1 = vcmp.lt.s32.totalorder %v92_v4, %v95_v6  ;;  %vm99_vm2 = vcmp.eq.s32.totalorder %v92_v4, %v95_v6 }
  0x85   :  { %v101_v7 = vsel %vm99_vm2, %v87_v5, -inf }
  0x86   :  { %v104_v8 = vsel %vm103_vm0, %v101_v7, -inf }
  0x87   :  { %v98_v10 = vpop.permute.xlu0 %97  ;;  %105 = vmax.xlane.f32.xlu1 %v104_v8 }
  0x88   :  { %vm100_vm3 = vcmp.eq.s32.totalorder %v92_v4, %v98_v10  ;;  %vm115_vm8 = vcmp.lt.s32.totalorder %v92_v4, %v98_v10 }
  0x89   :  { %v102_v11 = vsel %vm100_vm3, %v88_v9, -inf }
  0x8a   :  { %v107_v12 = vsel %vm103_vm0, %v102_v11, -inf }
  0x8b   :  { %108 = vmax.xlane.f32.xlu1 %v107_v12 }
 0x114   :  { %v106_v13 = vpop.xlane.xlu1 %105 }
 0x115   :  { %vm110_vm4 = vcmp.gt.f32.partialorder %v87_v5, %v106_v13  ;;  %vm112_vm5 = vcmp.eq.f32.partialorder %v87_v5, %v106_v13 }
 0x116   :  { %vm116_vm6 = vmand %vm112_vm5, %vm114_vm1 }
 0x117   :  { %vm118_vm7 = vmor %vm110_vm4, %vm116_vm6 }
 0x118   :  { %v120_v14 = vsel %vm118_vm7, 1, %v234_v1  ;;  %v109_v15 = vpop.xlane.xlu1 %108 }
 0x119   :  { %vm111_vm9 = vcmp.gt.f32.partialorder %v88_v9, %v109_v15  ;;  %vm113_vm10 = vcmp.eq.f32.partialorder %v88_v9, %v109_v15  ;;  %v122_v16 = vsel %vm103_vm0, %v120_v14, 0 }
 0x11a   :  { %vm117_vm11 = vmand %vm113_vm10, %vm115_vm8  ;;  %v124_v17 = vshrl.u32 %v122_v16, 16  ;;  %v123_v23 = vand.u32 65535, %v122_v16 }
 0x11b   :  { %vm119_vm12 = vmor %vm111_vm9, %vm117_vm11 }
 0x11c   :  { %v121_v18 = vsel %vm119_vm12, 1, %v234_v1  ;;  %v126_v19 = vcvt.s32.f32 %v124_v17  ;;  %v125_v24 = vcvt.s32.f32 %v123_v23 }
 0x11d   :  { %v135_v20 = vsel %vm103_vm0, %v121_v18, 0 }
 0x11e   :  { %129 = vadd.xlane.f32.xlu0 %v126_v19  ;;  %v137_v21 = vshrl.u32 %v135_v20, 16  ;;  %v136_v25 = vand.u32 65535, %v135_v20 }
 0x120   :  { %v139_v22 = vcvt.s32.f32 %v137_v21  ;;  %v138_v26 = vcvt.s32.f32 %v136_v25 }
 0x122   :  { %142 = vadd.xlane.f32.xlu1 %v139_v22 }
 0x126   :  { %127 = vadd.xlane.f32.xlu1 %v125_v24 }
 0x12a   :  { %140 = vadd.xlane.f32.xlu1 %v138_v26 }
 0x1ab   :  { %v130_v27 = vpop.xlane.xlu0 %129 }
 0x1ac   :  { %v132_v29 = vcvt.f32.s32 %v130_v27 }
 0x1ae   :  { %v133_v31 = vshll.u32 %v132_v29, 16 }
 0x1af   :  { %v143_v28 = vpop.xlane.xlu1 %142 }
 0x1b0   :  { %v145_v32 = vcvt.f32.s32 %v143_v28 }
 0x1b2   :  { %v146_v37 = vshll.u32 %v145_v32, 16 }
 0x1b3   :  { %v128_v30 = vpop.xlane.xlu1 %127 }
 0x1b4   :  { %v131_v33 = vcvt.f32.s32 %v128_v30 }
 0x1b6   :  { %v134_v34 = vadd.s32 %v133_v31, %v131_v33 }
 0x1b7   :  { %v141_v36 = vpop.xlane.xlu1 %140 }
 0x1b8   :  { %v144_v38 = vcvt.f32.s32 %v141_v36  ;;  %vm160_vm13 = vcmp.lt.s32.totalorder %v134_v34, %v203_v35 }
 0x1b9   :  { %v204_v41 = vsel %vm160_vm13, 1.0, %v235_v40 }
 0x1ba   :  { %v147_v39 = vadd.s32 %v146_v37, %v144_v38 }
 0x1bc   :  { %vm161_vm14 = vcmp.lt.s32.totalorder %v147_v39, %v203_v35 }
 0x1bd   :  { %v205_v42 = vsel %vm161_vm14, 1.0, %v235_v40 }
 0x1be   :  { %v172_v43 = vadd.f32 %v205_v42, %v204_v41 }
 0x1c0   :  { %176 = vst [vmem:[#allocation2] sm:$0xff] %v172_v43 }
 0x1c1   :  { %221 = shalt.err (!%p218_p4)
}
 0x1c2   :  { %s222_s24 = scalar_lea.hbm %s291_s3, 128 }
 0x1c3   :  { %p223_p5 = scmp.ne.s32.totalorder %s291_s3, %s222_s24  ;;  %p226_p6 = scmp.lt.u32.totalorder %s222_s24, %s291_s3 }
 0x1c5   :  { %p228_p7 = pnand %p226_p6, %p223_p5 }
 0x1c7   :  { %231 = shalt.err (!%p228_p7)
}
 0x1c8   :  { %186 = dma.vmem_to_hbm [thread:$0]  %s184_s21, 128, %s291_s3, [#allocation3]  }
 0x1c9   :  { %232 = dma.done.wait [#allocation3], 128  }
 0x1ca   :  { %233 = vsyncadd [#allocation3], 4294967168 }
 0x1cb   :  { %190 = vsyncpa [#allocation3], 1 }

</bundles_post_ra>
